<compile_context>
chip_gen: v5e
topology: v5e:2x2
jax: 0.10.0
libtpu: 0.0.40
codegen_flags: <defaults>
</compile_context>

<pallas_src>
import jax
import jax.numpy as jnp
from jax.experimental import pallas as pl


# -----------------------------------------------------------------------------
# Parameter / buffer setup (plain JAX glue)
# -----------------------------------------------------------------------------
def calculate_laplacian_with_self_loop(adj: jnp.ndarray) -> jnp.ndarray:
    m = adj + jnp.eye(adj.shape[0], dtype=adj.dtype)
    row_sum = m.sum(axis=1)
    d_inv_sqrt = jnp.power(row_sum, -0.5)
    d_inv_sqrt = jnp.where(jnp.isinf(d_inv_sqrt), 0.0, d_inv_sqrt)
    d = jnp.diag(d_inv_sqrt)
    return (m @ d).T @ d


def xavier_uniform(key, shape):
    # Mimics torch.nn.init.xavier_uniform_ fan computation for a 4D tensor.
    rf = 1
    for d in shape[2:]:
        rf *= d
    fan_in = shape[1] * rf
    fan_out = shape[0] * rf
    bound = (6.0 / (fan_in + fan_out)) ** 0.5
    return jax.random.uniform(key, shape, jnp.float32, -bound, bound)


# -----------------------------------------------------------------------------
# Fused TGCN-cell Pallas kernel
# -----------------------------------------------------------------------------
# In-kernel layout (all 2-D, batch folded into rows):
#   x2 : (B*N, C)      row (b, n)
#   h2 : (B*N, H*C)    row (b, n), col (hh, c)  <->  h[b, n*H + hh, c]
# Conv outputs live in (row=(b,n), col=(o,c)) layout; the laplacian acts on the node/row axis via
# block-diagonal kron(I_B, L), so one 2-D matmul covers every batch element.
#
# torch.chunk(conc, 2, dim=1) halves the flattened (node*2H) axis of conc (B, N*2H, C).
# Mapped into h-layout this is a fixed row gather of the conv1 output G plus a choice of its
# left/right column half:
#   r2[(b,m), hh*C+c] = G[(b, m//2),     (H*( m   %2)+hh)*C + c]
#   u2[(b,m), hh*C+c] = G[(b, (N+m)//2), (H*((N+m)%2)+hh)*C + c]
# That re-layout is folded into four precomputed "selection laplacians" (rows of L gathered and
# parity-masked) combined with a left/right column split of the conv1 weights & bias, keeping the
# kernel body pure matmul + elementwise.
def _tgcn_cell_kernel(x_ref, h_ref, lblk_ref, ler_ref, lor_ref, leu_ref, lou_ref,
                      w1xl_ref, w1hl_ref, w1xr_ref, w1hr_ref,
                      w2x_ref, w2h_ref, br_ref, bu_ref, b2_ref, out_ref):
    f32 = jnp.float32
    x = x_ref[...]                                   # (BN, C)
    h = h_ref[...]                                   # (BN, HC)

    # conv1 feature-side matmuls (weights pre-split into left/right gate column halves).
    z1l = (jnp.dot(x, w1xl_ref[...], preferred_element_type=f32)
           + jnp.dot(h, w1hl_ref[...], preferred_element_type=f32))
    z1r = (jnp.dot(x, w1xr_ref[...], preferred_element_type=f32)
           + jnp.dot(h, w1hr_ref[...], preferred_element_type=f32))

    # Graph side: selection laplacians fuse "L @ (.)" with the torch.chunk re-layout.
    r = jax.nn.sigmoid(jnp.dot(ler_ref[...], z1l, preferred_element_type=f32)
                       + jnp.dot(lor_ref[...], z1r, preferred_element_type=f32)
                       + br_ref[...])
    u = jax.nn.sigmoid(jnp.dot(leu_ref[...], z1l, preferred_element_type=f32)
                       + jnp.dot(lou_ref[...], z1r, preferred_element_type=f32)
                       + bu_ref[...])

    # conv2 on [x ; r*h] (weights pre-split by rows, so no in-kernel concatenation needed).
    rh = r * h
    z2 = (jnp.dot(x, w2x_ref[...], preferred_element_type=f32)
          + jnp.dot(rh, w2h_ref[...], preferred_element_type=f32))
    c = jnp.tanh(jnp.dot(lblk_ref[...], z2, preferred_element_type=f32) + b2_ref[...])

    # GRU combine, written straight to the (aliased) output.
    out_ref[...] = (u * h + (1.0 - u) * c).astype(out_ref.dtype)


@jax.jit
def _tgcn_cell_apply(x, h, consts):
    B, N, C = x.shape
    BN = B * N
    HC = consts["w2h"].shape[0]           # H * C
    x2 = x.reshape(BN, C)                 # contiguous reshapes: free layout plumbing
    h2 = h.reshape(BN, HC)
    new_h2 = pl.pallas_call(
        _tgcn_cell_kernel,
        out_shape=jax.ShapeDtypeStruct((BN, HC), jnp.float32),
        # Single launch, whole operands resident in VMEM (<64 KiB total) -> no grid needed.
        # Alias hidden state (input 1) to the output so its HBM buffer is reused when donated.
        input_output_aliases={1: 0},
    )(x2, h2,
      consts["lblk"], consts["ler"], consts["lor"], consts["leu"], consts["lou"],
      consts["w1xl"], consts["w1hl"], consts["w1xr"], consts["w1hr"],
      consts["w2x"], consts["w2h"], consts["br"], consts["bu"], consts["b2"])
    return new_h2.reshape(h.shape)


# -----------------------------------------------------------------------------
# TGCNCell wrapper
# -----------------------------------------------------------------------------
class TGCNCellPallas:
    def __init__(self, adj, input_dim, hidden_dim, channels, key):
        del input_dim  # unused by the forward pass (matches the PyTorch module)
        self.hidden_dim = hidden_dim
        self.channels = channels
        self.laplacian = calculate_laplacian_with_self_loop(adj.astype(jnp.float32))
        H, C = hidden_dim, channels
        HC = H * C
        k1, k2 = jax.random.split(key)
        # Raw parameters, same init as the PyTorch module (kept for the reference check).
        self.w1 = xavier_uniform(k1, (H + 1, 2 * H, C, C))   # graph_conv1, bias=1.0
        self.b1 = jnp.full((2 * H, C), 1.0, jnp.float32)
        self.w2 = xavier_uniform(k2, (H + 1, H, C, C))       # graph_conv2, bias=0.0
        self.b2 = jnp.zeros((H, C), jnp.float32)

        # ---- batch-independent precompute: flattened / split weights & biases ----
        # W[k, o, j, i] -> W_flat[(k*C + j), (o*C + i)]
        w1f = jnp.transpose(self.w1, (0, 2, 1, 3)).reshape((H + 1) * C, 2 * HC)
        w2f = jnp.transpose(self.w2, (0, 2, 1, 3)).reshape((H + 1) * C, HC)
        self._w1xl, self._w1xr = w1f[:C, :HC], w1f[:C, HC:]   # x rows (k=0), left/right cols
        self._w1hl, self._w1hr = w1f[C:, :HC], w1f[C:, HC:]   # h rows (k>=1), left/right cols
        self._w2x, self._w2h = w2f[:C], w2f[C:]
        b1f = self.b1.reshape(1, 2 * HC)
        self._b1_halves = jnp.concatenate([b1f[:, :HC], b1f[:, HC:]], axis=0)  # (2, HC)
        self._b2f = self.b2.reshape(1, HC)

        # Selection laplacians encoding the torch.chunk(dim=1) re-layout (see kernel comment).
        N = self.laplacian.shape[0]
        m = jnp.arange(N)

        def sel(src_rows, want_half, half):
            mask = (half == want_half).astype(jnp.float32)[:, None]
            return self.laplacian[src_rows] * mask

        self._ler = sel(m // 2, 0, m % 2)                    # r, even dest rows -> left half
        self._lor = sel(m // 2, 1, m % 2)                    # r, odd  dest rows -> right half
        self._leu = sel((N + m) // 2, 0, (N + m) % 2)        # u, left half
        self._lou = sel((N + m) // 2, 1, (N + m) % 2)        # u, right half

        self._consts_cache = {}

    def _consts(self, batch_size):
        # Per-batch-size constants (block-diagonal laplacians, tiled biases), built once & cached.
        if batch_size not in self._consts_cache:
            N = self.laplacian.shape[0]
            m = jnp.arange(N)
            eye_b = jnp.eye(batch_size, dtype=jnp.float32)
            blk = lambda mat: jnp.kron(eye_b, mat)           # fold batch into the node matmul
            br = jnp.tile(self._b1_halves[m % 2], (batch_size, 1))          # (B*N, HC)
            bu = jnp.tile(self._b1_halves[(N + m) % 2], (batch_size, 1))    # (B*N, HC)
            self._consts_cache[batch_size] = dict(
                lblk=blk(self.laplacian),
                ler=blk(self._ler), lor=blk(self._lor),
                leu=blk(self._leu), lou=blk(self._lou),
                w1xl=self._w1xl, w1hl=self._w1hl,
                w1xr=self._w1xr, w1hr=self._w1hr,
                w2x=self._w2x, w2h=self._w2h,
                br=br, bu=bu, b2=self._b2f)
        return self._consts_cache[batch_size]

    def __call__(self, x, h):
        consts = self._consts(x.shape[0])
        new_h = _tgcn_cell_apply(x, h, consts)
        return new_h, new_h


# -----------------------------------------------------------------------------
# Pure-JAX reference (literal transcription of the PyTorch forward_v2 / cell)
# -----------------------------------------------------------------------------
def _ref_graph_conv(lap, x, h, w, b):
    B, N, C = x.shape
    Kp1, OD, _, OC = w.shape
    H = Kp1 - 1
    xr = x.reshape(B, N, 1, C)
    hr = h.reshape(B, N, H, C)
    cat = jnp.concatenate([xr, hr], axis=2)                             # (B,N,H+1,C)
    cat = jnp.transpose(cat, (1, 2, 0, 3)).reshape(N, (H + 1) * B * C)
    atc = lap @ cat
    atc = atc.reshape(N, H + 1, B, C)
    atc = jnp.transpose(atc, (2, 0, 1, 3)).reshape(B * N, H + 1, C)
    outputs = jnp.zeros((B, N * OD, OC), x.dtype)
    for i in range(OC):
        for j in range(C):
            conv = atc[:, :, j] @ w[:, :, j, i]
            conv = conv.reshape(B, N * OD)
            outputs = outputs.at[:, :, i].add(conv)
    outputs = outputs.reshape(B * N, OD, OC) + b
    return outputs.reshape(B, N * OD, OC)


def _ref_cell(lap, x, h, w1, b1, w2, b2):
    conc = jax.nn.sigmoid(_ref_graph_conv(lap, x, h, w1, b1))
    r, u = jnp.split(conc, 2, axis=1)
    c = jnp.tanh(_ref_graph_conv(lap, x, r * h, w2, b2))
    return u * h + (1.0 - u) * c


# -----------------------------------------------------------------------------
# Main
# -----------------------------------------------------------------------------
if __name__ == "__main__":
    key = jax.random.PRNGKey(0)
    B, N, H, C = 2, 16, 8, 2  # batch, nodes, hidden(gru units), channels
    k_adj, k_x, k_h, k_p = jax.random.split(key, 4)

    a = jax.random.uniform(k_adj, (N, N), jnp.float32)
    adj = (a + a.T) * 0.5                                  # symmetric non-negative adjacency
    x = jax.random.normal(k_x, (B, N, C), jnp.float32)
    h0 = jax.random.normal(k_h, (B, N * H, C), jnp.float32)

    cell = TGCNCellPallas(adj, input_dim=N, hidden_dim=H, channels=C, key=k_p)
    new_h, out = cell(x, h0)
    jax.block_until_ready(new_h)

    ref = _ref_cell(cell.laplacian, x, h0, cell.w1, cell.b1, cell.w2, cell.b2)
    assert new_h.shape == (B, N * H, C)
    assert jnp.allclose(new_h, ref, atol=1e-3, rtol=1e-3), "Pallas output mismatch vs reference"

    print("KERNEL_OK")
</pallas_src>

<mosaic_0001>
module attributes {stable_mosaic.version = 11 : i64} {
  func.func @_tgcn_cell_kernel(%arg0: memref<32x2xf32, #tpu.memory_space<vmem>>, %arg1: memref<32x16xf32, #tpu.memory_space<vmem>>, %arg2: memref<32x32xf32, #tpu.memory_space<vmem>>, %arg3: memref<32x32xf32, #tpu.memory_space<vmem>>, %arg4: memref<32x32xf32, #tpu.memory_space<vmem>>, %arg5: memref<32x32xf32, #tpu.memory_space<vmem>>, %arg6: memref<32x32xf32, #tpu.memory_space<vmem>>, %arg7: memref<2x16xf32, #tpu.memory_space<vmem>>, %arg8: memref<16x16xf32, #tpu.memory_space<vmem>>, %arg9: memref<2x16xf32, #tpu.memory_space<vmem>>, %arg10: memref<16x16xf32, #tpu.memory_space<vmem>>, %arg11: memref<2x16xf32, #tpu.memory_space<vmem>>, %arg12: memref<16x16xf32, #tpu.memory_space<vmem>>, %arg13: memref<32x16xf32, #tpu.memory_space<vmem>>, %arg14: memref<32x16xf32, #tpu.memory_space<vmem>>, %arg15: memref<1x16xf32, #tpu.memory_space<vmem>>, %arg16: memref<32x16xf32, #tpu.memory_space<vmem>>) attributes {dimension_semantics = [], scalar_prefetch = 0 : i64, scratch_operands = 0 : i64, tpu.core_type = #tpu.core_type<tc>} {
    %c0 = arith.constant 0 : index
    %c0_0 = arith.constant 0 : index
    %0 = vector.load %arg0[%c0, %c0_0] : memref<32x2xf32, #tpu.memory_space<vmem>>, vector<32x2xf32>
    %c0_1 = arith.constant 0 : index
    %c0_2 = arith.constant 0 : index
    %1 = vector.load %arg1[%c0_1, %c0_2] : memref<32x16xf32, #tpu.memory_space<vmem>>, vector<32x16xf32>
    %c0_3 = arith.constant 0 : index
    %c0_4 = arith.constant 0 : index
    %2 = vector.load %arg7[%c0_3, %c0_4] : memref<2x16xf32, #tpu.memory_space<vmem>>, vector<2x16xf32>
    %cst = arith.constant dense<0.000000e+00> : vector<32x16xf32>
    %3 = tpu.matmul %0, %2, %cst {dimension_numbers = #tpu.dot_dimension_numbers<[1], [0], [0], [1], [0, 0, 1, 1], [], []>} : vector<32x2xf32>, vector<2x16xf32>, vector<32x16xf32> -> vector<32x16xf32>
    %c0_5 = arith.constant 0 : index
    %c0_6 = arith.constant 0 : index
    %4 = vector.load %arg8[%c0_5, %c0_6] : memref<16x16xf32, #tpu.memory_space<vmem>>, vector<16x16xf32>
    %cst_7 = arith.constant dense<0.000000e+00> : vector<32x16xf32>
    %5 = tpu.matmul %1, %4, %cst_7 {dimension_numbers = #tpu.dot_dimension_numbers<[1], [0], [0], [1], [0, 0, 1, 1], [], []>} : vector<32x16xf32>, vector<16x16xf32>, vector<32x16xf32> -> vector<32x16xf32>
    %6 = arith.addf %3, %5 : vector<32x16xf32>
    %c0_8 = arith.constant 0 : index
    %c0_9 = arith.constant 0 : index
    %7 = vector.load %arg9[%c0_8, %c0_9] : memref<2x16xf32, #tpu.memory_space<vmem>>, vector<2x16xf32>
    %cst_10 = arith.constant dense<0.000000e+00> : vector<32x16xf32>
    %8 = tpu.matmul %0, %7, %cst_10 {dimension_numbers = #tpu.dot_dimension_numbers<[1], [0], [0], [1], [0, 0, 1, 1], [], []>} : vector<32x2xf32>, vector<2x16xf32>, vector<32x16xf32> -> vector<32x16xf32>
    %c0_11 = arith.constant 0 : index
    %c0_12 = arith.constant 0 : index
    %9 = vector.load %arg10[%c0_11, %c0_12] : memref<16x16xf32, #tpu.memory_space<vmem>>, vector<16x16xf32>
    %cst_13 = arith.constant dense<0.000000e+00> : vector<32x16xf32>
    %10 = tpu.matmul %1, %9, %cst_13 {dimension_numbers = #tpu.dot_dimension_numbers<[1], [0], [0], [1], [0, 0, 1, 1], [], []>} : vector<32x16xf32>, vector<16x16xf32>, vector<32x16xf32> -> vector<32x16xf32>
    %11 = arith.addf %8, %10 : vector<32x16xf32>
    %c0_14 = arith.constant 0 : index
    %c0_15 = arith.constant 0 : index
    %12 = vector.load %arg3[%c0_14, %c0_15] : memref<32x32xf32, #tpu.memory_space<vmem>>, vector<32x32xf32>
    %cst_16 = arith.constant dense<0.000000e+00> : vector<32x16xf32>
    %13 = tpu.matmul %12, %6, %cst_16 {dimension_numbers = #tpu.dot_dimension_numbers<[1], [0], [0], [1], [0, 0, 1, 1], [], []>} : vector<32x32xf32>, vector<32x16xf32>, vector<32x16xf32> -> vector<32x16xf32>
    %c0_17 = arith.constant 0 : index
    %c0_18 = arith.constant 0 : index
    %14 = vector.load %arg4[%c0_17, %c0_18] : memref<32x32xf32, #tpu.memory_space<vmem>>, vector<32x32xf32>
    %cst_19 = arith.constant dense<0.000000e+00> : vector<32x16xf32>
    %15 = tpu.matmul %14, %11, %cst_19 {dimension_numbers = #tpu.dot_dimension_numbers<[1], [0], [0], [1], [0, 0, 1, 1], [], []>} : vector<32x32xf32>, vector<32x16xf32>, vector<32x16xf32> -> vector<32x16xf32>
    %16 = arith.addf %13, %15 : vector<32x16xf32>
    %c0_20 = arith.constant 0 : index
    %c0_21 = arith.constant 0 : index
    %17 = vector.load %arg13[%c0_20, %c0_21] : memref<32x16xf32, #tpu.memory_space<vmem>>, vector<32x16xf32>
    %18 = arith.addf %16, %17 : vector<32x16xf32>
    %19 = arith.negf %18 : vector<32x16xf32>
    %20 = math.exp %19 : vector<32x16xf32>
    %cst_22 = arith.constant 1.000000e+00 : f32
    %21 = vector.broadcast %cst_22 : f32 to vector<32x16xf32>
    %22 = arith.addf %21, %20 : vector<32x16xf32>
    %23 = arith.divf %21, %22 : vector<32x16xf32>
    %c0_23 = arith.constant 0 : index
    %c0_24 = arith.constant 0 : index
    %24 = vector.load %arg5[%c0_23, %c0_24] : memref<32x32xf32, #tpu.memory_space<vmem>>, vector<32x32xf32>
    %cst_25 = arith.constant dense<0.000000e+00> : vector<32x16xf32>
    %25 = tpu.matmul %24, %6, %cst_25 {dimension_numbers = #tpu.dot_dimension_numbers<[1], [0], [0], [1], [0, 0, 1, 1], [], []>} : vector<32x32xf32>, vector<32x16xf32>, vector<32x16xf32> -> vector<32x16xf32>
    %c0_26 = arith.constant 0 : index
    %c0_27 = arith.constant 0 : index
    %26 = vector.load %arg6[%c0_26, %c0_27] : memref<32x32xf32, #tpu.memory_space<vmem>>, vector<32x32xf32>
    %cst_28 = arith.constant dense<0.000000e+00> : vector<32x16xf32>
    %27 = tpu.matmul %26, %11, %cst_28 {dimension_numbers = #tpu.dot_dimension_numbers<[1], [0], [0], [1], [0, 0, 1, 1], [], []>} : vector<32x32xf32>, vector<32x16xf32>, vector<32x16xf32> -> vector<32x16xf32>
    %28 = arith.addf %25, %27 : vector<32x16xf32>
    %c0_29 = arith.constant 0 : index
    %c0_30 = arith.constant 0 : index
    %29 = vector.load %arg14[%c0_29, %c0_30] : memref<32x16xf32, #tpu.memory_space<vmem>>, vector<32x16xf32>
    %30 = arith.addf %28, %29 : vector<32x16xf32>
    %31 = arith.negf %30 : vector<32x16xf32>
    %32 = math.exp %31 : vector<32x16xf32>
    %cst_31 = arith.constant 1.000000e+00 : f32
    %33 = vector.broadcast %cst_31 : f32 to vector<32x16xf32>
    %34 = arith.addf %33, %32 : vector<32x16xf32>
    %35 = arith.divf %33, %34 : vector<32x16xf32>
    %36 = arith.mulf %23, %1 : vector<32x16xf32>
    %c0_32 = arith.constant 0 : index
    %c0_33 = arith.constant 0 : index
    %37 = vector.load %arg11[%c0_32, %c0_33] : memref<2x16xf32, #tpu.memory_space<vmem>>, vector<2x16xf32>
    %cst_34 = arith.constant dense<0.000000e+00> : vector<32x16xf32>
    %38 = tpu.matmul %0, %37, %cst_34 {dimension_numbers = #tpu.dot_dimension_numbers<[1], [0], [0], [1], [0, 0, 1, 1], [], []>} : vector<32x2xf32>, vector<2x16xf32>, vector<32x16xf32> -> vector<32x16xf32>
    %c0_35 = arith.constant 0 : index
    %c0_36 = arith.constant 0 : index
    %39 = vector.load %arg12[%c0_35, %c0_36] : memref<16x16xf32, #tpu.memory_space<vmem>>, vector<16x16xf32>
    %cst_37 = arith.constant dense<0.000000e+00> : vector<32x16xf32>
    %40 = tpu.matmul %36, %39, %cst_37 {dimension_numbers = #tpu.dot_dimension_numbers<[1], [0], [0], [1], [0, 0, 1, 1], [], []>} : vector<32x16xf32>, vector<16x16xf32>, vector<32x16xf32> -> vector<32x16xf32>
    %41 = arith.addf %38, %40 : vector<32x16xf32>
    %c0_38 = arith.constant 0 : index
    %c0_39 = arith.constant 0 : index
    %42 = vector.load %arg2[%c0_38, %c0_39] : memref<32x32xf32, #tpu.memory_space<vmem>>, vector<32x32xf32>
    %cst_40 = arith.constant dense<0.000000e+00> : vector<32x16xf32>
    %43 = tpu.matmul %42, %41, %cst_40 {dimension_numbers = #tpu.dot_dimension_numbers<[1], [0], [0], [1], [0, 0, 1, 1], [], []>} : vector<32x32xf32>, vector<32x16xf32>, vector<32x16xf32> -> vector<32x16xf32>
    %c0_41 = arith.constant 0 : index
    %c0_42 = arith.constant 0 : index
    %44 = vector.load %arg15[%c0_41, %c0_42] : memref<1x16xf32, #tpu.memory_space<vmem>>, vector<1x16xf32>
    %45 = vector.broadcast %44 : vector<1x16xf32> to vector<32x16xf32>
    %46 = arith.addf %43, %45 : vector<32x16xf32>
    %47 = math.tanh %46 : vector<32x16xf32>
    %48 = arith.mulf %35, %1 : vector<32x16xf32>
    %cst_43 = arith.constant 1.000000e+00 : f32
    %49 = vector.broadcast %cst_43 : f32 to vector<32x16xf32>
    %50 = arith.subf %49, %35 : vector<32x16xf32>
    %51 = arith.mulf %50, %47 : vector<32x16xf32>
    %52 = arith.addf %48, %51 : vector<32x16xf32>
    %c0_44 = arith.constant 0 : index
    %c0_45 = arith.constant 0 : index
    %53 = vector.load %arg16[%c0_44, %c0_45] : memref<32x16xf32, #tpu.memory_space<vmem>>, vector<32x16xf32>
    tpu.vector_store %arg16[%c0_44, %c0_45], %52 {strides = array<i32>} : memref<32x16xf32, #tpu.memory_space<vmem>>, vector<32x16xf32>,
    return
  }
}

</mosaic_0001>

<bundles_post_ra>
// kernel: _tgcn_cell_apply.1
= control target key start
LH: loop header
LB: loop body
LE: loop exit
PB: predicated region body
PF: predicated region fallthrough
CT: control target
= control target key end

     0   :  { %vm119_vm0 = vcmask 1041408   ;;  %vm106_vm1 = vcmask 15360   ;;  %vm64_vm2 = vcmask 130048   ;;  %vm224_vm3 = vcmask 261120   ;;  %s1182_s8 = inlined_call_operand.vmem [shape: f32[16,16], index: 8, kind: input, shape index: {}]   ;;  %s1183_s7 = inlined_call_operand.vmem [shape: f32[2,16], index: 7, kind: input, shape index: {}]   ;;  %s1184_s0 = inlined_call_operand.vmem [shape: f32[32,2], index: 0, kind: input, shape index: {}]   ;;  %s1185_s1 = inlined_call_operand.vmem [shape: f32[32,16], index: 1, kind: input, shape index: {}, may-alias: {1,16}]   ;;  %s1186_s10 = inlined_call_operand.vmem [shape: f32[16,16], index: 10, kind: input, shape index: {}]   ;;  %s1187_s9 = inlined_call_operand.vmem [shape: f32[2,16], index: 9, kind: input, shape index: {}]   ;;  %s1188_s3 = inlined_call_operand.vmem [shape: f32[32,32], index: 3, kind: input, shape index: {}]   ;;  %s1189_s4 = inlined_call_operand.vmem [shape: f32[32,32], index: 4, kind: input, shape index: {}]   ;;  %s1190_s11 = inlined_call_operand.vmem [shape: f32[2,16], index: 11, kind: input, shape index: {}]   ;;  %s1191_s12 = inlined_call_operand.vmem [shape: f32[16,16], index: 12, kind: input, shape index: {}]   ;;  %s1192_s13 = inlined_call_operand.vmem [shape: f32[32,16], index: 13, kind: input, shape index: {}]   ;;  %s1193_s5 = inlined_call_operand.vmem [shape: f32[32,32], index: 5, kind: input, shape index: {}]   ;;  %s1194_s6 = inlined_call_operand.vmem [shape: f32[32,32], index: 6, kind: input, shape index: {}]   ;;  %s1195_s15 = inlined_call_operand.vmem [shape: f32[1,16], index: 15, kind: input, shape index: {}]   ;;  %s1196_s2 = inlined_call_operand.vmem [shape: f32[32,32], index: 2, kind: input, shape index: {}]   ;;  %s1197_s14 = inlined_call_operand.vmem [shape: f32[32,16], index: 14, kind: input, shape index: {}]   ;;  %s1198_s16 = inlined_call_operand.vmem [shape: f32[32,16], index: 16, kind: output, shape index: {}, may-alias: {1,16}]  }
   0x1   :  { %1200 = sst [smem:[#allocation2_spill]] %s1182_s8  ;;  %v61_v1 = vld [vmem:[%s1183_s7] sm:$0x3]  ;;  %v923_v4 = vld [vmem:[%s1185_s1 + $0x8] sm:$0xff]  ;;  %v956_v10 = vld [vmem:[%s1185_s1 + $0x10] sm:$0xff] }
   0x2   :  { %s1201_s23 = sld [smem:[#allocation2_spill]]  ;;  %v914_v2 = vld [vmem:[%s1184_s0] sm:$0xff]  ;;  %726 = vmatpush.msk.msra.mxu1 %vm119_vm0, %v61_v1  ;;  %v154_v5 = vld [vmem:[%s1186_s10 + $0x8] sm:$0xff]  ;;  %v967_v11 = vld [vmem:[%s1184_s0 + $0x10] sm:$0xff] }
   0x3   :  { %727 = vmatmul.msk.f32.vlgmr.msra.gmra.mxu1 %vm106_vm1, %v914_v2  ;;  %v153_v6 = vld [vmem:[%s1186_s10] sm:$0xff]  ;;  %v951_v9 = vld [vmem:[%s1184_s0 + $0x8] sm:$0xff]  ;;  %v972_v12 = vld [vmem:[%s1185_s1 + $0x18] sm:$0xff] }
   0x4   :  { %v152_v7 = vld [vmem:[%s1187_s9] sm:$0x3]  ;;  %v983_v13 = vld [vmem:[%s1184_s0 + $0x18] sm:$0xff]  ;;  %v217_v30 = vld [vmem:[%s1188_s3 + $0x8] sm:$0xff] }
   0x5   :  { %v941_v8 = vld [vmem:[%s1185_s1] sm:$0xff]  ;;  %735 = vmatpush.msk.msra.mxu3 %vm119_vm0, %v152_v7  ;;  %v218_v33 = vld [vmem:[%s1188_s3 + $0x10] sm:$0xff]  ;;  %v219_v36 = vld [vmem:[%s1188_s3 + $0x18] sm:$0xff] }
   0x6   :  { %736 = vmatmul.msk.f32.vlgmr.msra.gmra.mxu3 %vm106_vm1, %v914_v2  ;;  %v216_v27 = vld [vmem:[%s1188_s3] sm:$0xff]  ;;  %v221_v43 = vld [vmem:[%s1189_s4 + $0x8] sm:$0xff]  ;;  %v222_v44 = vld [vmem:[%s1189_s4 + $0x10] sm:$0xff] }
   0x7   :  { %v220_v42 = vld [vmem:[%s1189_s4] sm:$0xff]  ;;  %v223_v45 = vld [vmem:[%s1189_s4 + $0x18] sm:$0xff]  ;;  %v571_v48 = vld [vmem:[%s1191_s12 + $0x8] sm:$0xff] }
   0x8   :  { %v63_v0 = vld [vmem:[%s1201_s23 + $0x8] sm:$0xff]  ;;  %v62_v3 = vld [vmem:[%s1201_s23] sm:$0xff]  ;;  %v309_v1 = vld [vmem:[%s1192_s13 + $0x10] sm:$0xff] }
   0x9   :  { %777 = vmatpush.msra.mxu2 %v63_v0  ;;  %91 = vmatpush.msra.mxu0 %v63_v0  ;;  %v569_v47 = vld [vmem:[%s1190_s11] sm:$0x3]  ;;  %v308_v57 = vld [vmem:[%s1192_s13 + $0x8] sm:$0xff] }
   0xa   :  { %v307_v50 = vld [vmem:[%s1192_s13] sm:$0xff] }
   0xb   :  { %778 = vmatpush.msra.mxu2 %v62_v3  ;;  %92 = vmatpush.msra.mxu0 %v62_v3  ;;  %v570_v52 = vld [vmem:[%s1191_s12] sm:$0xff] }
   0xc   :  { %723 = vmatmul.msk.f32.vlgmr.msra.gmra.mxu2 %vm64_vm2, %v923_v4  ;;  %722 = vmatmul.msk.f32.vlgmr.msra.gmra.mxu0 %vm64_vm2, %v941_v8 }
   0xd   :  { %169 = vmatpush.msrb.mxu2 %v154_v5  ;;  %728 = vmatmul.msk.f32.gmra.mxu1 %vm106_vm1, %v951_v9 }
   0xe   :  { %737 = vmatmul.msk.f32.gmra.mxu3 %vm106_vm1, %v951_v9 }
   0xf   :  { %170 = vmatpush.msrb.mxu2 %v153_v6 }
  0x14   :  { %724 = vmatmul.msk.f32.gmra.mxu2 %vm64_vm2, %v956_v10 }
  0x15   :  { %729 = vmatmul.msk.f32.gmra.mxu1 %vm106_vm1, %v967_v11 }
  0x16   :  { %738 = vmatmul.msk.f32.gmra.mxu3 %vm106_vm1, %v967_v11 }
  0x1c   :  { %725 = vmatmul.msk.f32.gmra.mxu2 %vm64_vm2, %v972_v12 }
  0x1d   :  { %730 = vmatmul.msk.f32.gmra.mxu1 %vm106_vm1, %v983_v13 }
  0x1e   :  { %739 = vmatmul.msk.f32.gmra.mxu3 %vm106_vm1, %v983_v13 }
  0x24   :  { %731 = vmatmul.msk.f32.vlgmr.msrb.gmra.mxu2 %vm64_vm2, %v941_v8 }
  0x2c   :  { %732 = vmatmul.msk.f32.gmra.mxu2 %vm64_vm2, %v923_v4 }
  0x34   :  { %733 = vmatmul.msk.f32.gmra.mxu2 %vm64_vm2, %v956_v10 }
  0x3c   :  { %734 = vmatmul.msk.f32.gmra.mxu2 %vm64_vm2, %v972_v12 }
  0x80   :  { %v140_v14 = vpop.f32.mrf.mxu1 }
  0x89   :  { %v204_v19 = vpop.f32.mrf.mxu3  ;;  %v94_v24 = vpop.f32.mrf.mxu0 }
  0x8a   :  { %v143_v16 = vpop.f32.mrf.mxu1  ;;  %v141_v26 = vadd.f32 %v140_v14, %v94_v24 }
  0x8f   :  { %v97_v15 = vpop.f32.mrf.mxu2 }
  0x90   :  { %v144_v25 = vadd.f32 %v143_v16, %v97_v15  ;;  %v310_v16 = vld [vmem:[%s1192_s13 + $0x18] sm:$0xff] }
  0x91   :  { %v207_v29 = vpop.f32.mrf.mxu3 }
  0x92   :  { %v146_v18 = vpop.f32.mrf.mxu1 }
  0x97   :  { %v100_v17 = vpop.f32.mrf.mxu2 }
  0x98   :  { %v147_v23 = vadd.f32 %v146_v18, %v100_v17 }
  0x99   :  { %v210_v32 = vpop.f32.mrf.mxu3 }
  0x9a   :  { %v149_v21 = vpop.f32.mrf.mxu1 }
  0x9f   :  { %v103_v20 = vpop.f32.mrf.mxu2 }
  0xa0   :  { %v150_v22 = vadd.f32 %v149_v21, %v103_v20 }
  0xa1   :  { %v213_v35 = vpop.f32.mrf.mxu3 }
  0xa2   :  { %290 = vmatpush.msrb.mxu3 %v150_v22  ;;  %464 = vmatpush.msra.mxu2 %v150_v22 }
  0xa4   :  { %291 = vmatpush.msrb.mxu3 %v147_v23  ;;  %465 = vmatpush.msra.mxu2 %v147_v23 }
  0xa6   :  { %292 = vmatpush.msrb.mxu3 %v144_v25  ;;  %466 = vmatpush.msra.mxu2 %v144_v25 }
  0xa7   :  { %v172_v28 = vpop.f32.mrf.mxu2 }
  0xa8   :  { %293 = vmatpush.msrb.mxu3 %v141_v26  ;;  %467 = vmatpush.msra.mxu2 %v141_v26  ;;  %v205_v41 = vadd.f32 %v204_v19, %v172_v28 }
  0xa9   :  { %744 = vmatmul.msk.f32.vlgmr.msrb.gmra.mxu3 %vm224_vm3, %v216_v27 }
  0xaa   :  { %768 = vmatpush.msk.msra.mxu3 %vm119_vm0, %v569_v47 }
  0xaf   :  { %v175_v31 = vpop.f32.mrf.mxu2 }
  0xb0   :  { %v208_v40 = vadd.f32 %v207_v29, %v175_v31 }
  0xb1   :  { %745 = vmatmul.msk.f32.gmra.mxu3 %vm224_vm3, %v217_v30 }
  0xb7   :  { %v178_v34 = vpop.f32.mrf.mxu2 }
  0xb8   :  { %v211_v39 = vadd.f32 %v210_v32, %v178_v34 }
  0xb9   :  { %746 = vmatmul.msk.f32.gmra.mxu3 %vm224_vm3, %v218_v33 }
  0xbf   :  { %v181_v37 = vpop.f32.mrf.mxu2 }
  0xc0   :  { %v214_v38 = vadd.f32 %v213_v35, %v181_v37 }
  0xc1   :  { %747 = vmatmul.msk.f32.gmra.mxu3 %vm224_vm3, %v219_v36 }
  0xc2   :  { %249 = vmatpush.msrb.mxu1 %v214_v38  ;;  %423 = vmatpush.msrb.mxu0 %v214_v38 }
  0xc4   :  { %250 = vmatpush.msrb.mxu1 %v211_v39  ;;  %424 = vmatpush.msrb.mxu0 %v211_v39 }
  0xc6   :  { %251 = vmatpush.msrb.mxu1 %v208_v40  ;;  %425 = vmatpush.msrb.mxu0 %v208_v40 }
  0xc8   :  { %252 = vmatpush.msrb.mxu1 %v205_v41  ;;  %426 = vmatpush.msrb.mxu0 %v205_v41 }
  0xc9   :  { %740 = vmatmul.msk.f32.vlgmr.msrb.gmra.mxu1 %vm224_vm3, %v220_v42  ;;  %769 = vmatmul.msk.f32.vlgmr.msra.gmra.mxu3 %vm106_vm1, %v914_v2 }
  0xca   :  { %598 = vmatpush.msra.mxu1 %v571_v48 }
  0xcc   :  { %599 = vmatpush.msra.mxu1 %v570_v52 }
  0xd1   :  { %741 = vmatmul.msk.f32.gmra.mxu1 %vm224_vm3, %v221_v43  ;;  %770 = vmatmul.msk.f32.gmra.mxu3 %vm106_vm1, %v951_v9 }
  0xd9   :  { %742 = vmatmul.msk.f32.gmra.mxu1 %vm224_vm3, %v222_v44  ;;  %771 = vmatmul.msk.f32.gmra.mxu3 %vm106_vm1, %v967_v11 }
  0xe1   :  { %743 = vmatmul.msk.f32.gmra.mxu1 %vm224_vm3, %v223_v45  ;;  %772 = vmatmul.msk.f32.gmra.mxu3 %vm106_vm1, %v983_v13 }
 0x12c   :  { %v295_v46 = vpop.f32.mrf.mxu3 }
 0x134   :  { %v298_v53 = vpop.f32.mrf.mxu3 }
 0x13c   :  { %v301_v60 = vpop.f32.mrf.mxu3 }
 0x144   :  { %v304_v14 = vpop.f32.mrf.mxu3 }
 0x146   :  { %v254_v49 = vpop.f32.mrf.mxu1 }
 0x147   :  { %v296_v51 = vadd.f32 %v295_v46, %v254_v49 }
 0x149   :  { %v311_v54 = vadd.f32 %v307_v50, %v296_v51 }
 0x14b   :  { %v748_v55 = vmul.f32 -1.442695, %v311_v54 }
 0x14d   :  { %780 = vpow2.f32 %v748_v55 }
 0x14e   :  { %v257_v56 = vpop.f32.mrf.mxu1 }
 0x14f   :  { %v299_v58 = vadd.f32 %v298_v53, %v257_v56 }
 0x151   :  { %v312_v59 = vadd.f32 %v308_v57, %v299_v58 }
 0x153   :  { %v781_v61 = vpop.eup %780  ;;  %v749_v62 = vmul.f32 -1.442695, %v312_v59 }
 0x154   :  { %v327_v63 = vadd.f32 1.0, %v781_v61 }
 0x155   :  { %782 = vpow2.f32 %v749_v62 }
 0x156   :  { %784 = vrcp.f32 %v327_v63  ;;  %v260_v0 = vpop.f32.mrf.mxu1  ;;  %v342_v19 = vand.u32 2147483648, %v327_v63  ;;  %v340_v22 = vand.u32 2147483647, %v327_v63  ;;  %vm336_vm5 = vweird.f32 %v327_v63 }
 0x157   :  { %v302_v2 = vadd.f32 %v301_v60, %v260_v0 }
 0x158   :  { %v343_v27 = vor.u32 1.1754944e-38, %v342_v19  ;;  %vm341_vm7 = vcmp.eq.f32.partialorder %v340_v22, 8.507059e+37 }
 0x159   :  { %v313_v3 = vadd.f32 %v309_v1, %v302_v2  ;;  %v391_v1 = vld [vmem:[%s1193_s5] sm:$0xff] }
 0x15a   :  { %756 = vmatmul.msk.f32.vlgmr.msra.gmra.mxu2 %vm224_vm3, %v391_v1  ;;  %v395_v2 = vld [vmem:[%s1194_s6] sm:$0xff] }
 0x15b   :  { %v783_v5 = vpop.eup %782  ;;  %v750_v6 = vmul.f32 -1.442695, %v313_v3  ;;  %752 = vmatmul.msk.f32.vlgmr.msrb.gmra.mxu0 %vm224_vm3, %v395_v2  ;;  %v392_v3 = vld [vmem:[%s1193_s5 + $0x8] sm:$0xff] }
 0x15c   :  { %v785_v7 = vpop.eup %784  ;;  %v328_v9 = vadd.f32 1.0, %v783_v5  ;;  %v396_v5 = vld [vmem:[%s1194_s6 + $0x8] sm:$0xff] }
 0x15d   :  { %v332_v15 = vmul.f32 %v785_v7, %v327_v63  ;;  %786 = vpow2.f32 %v750_v6  ;;  %vm337_vm4 = vweird.f32 %v785_v7  ;;  %v393_v6 = vld [vmem:[%s1193_s5 + $0x10] sm:$0xff] }
 0x15e   :  { %788 = vrcp.f32 %v328_v9  ;;  %v263_v11 = vpop.f32.mrf.mxu1  ;;  %vm338_vm6 = vmor %vm336_vm5, %vm337_vm4  ;;  %v357_v33 = vand.u32 2147483648, %v328_v9  ;;  %v355_v35 = vand.u32 2147483647, %v328_v9  ;;  %vm351_vm9 = vweird.f32 %v328_v9 }
 0x15f   :  { %v333_v17 = vsub.f32 1.0, %v332_v15  ;;  %v305_v18 = vadd.f32 %v304_v14, %v263_v11  ;;  %v398_v14 = vld [vmem:[%s1194_s6 + $0x18] sm:$0xff]  ;;  %v633_v15 = vpop.f32.mrf.mxu3 }
 0x160   :  { %v358_v40 = vor.u32 1.1754944e-38, %v357_v33  ;;  %vm356_vm11 = vcmp.eq.f32.partialorder %v355_v35, 8.507059e+37 }
 0x161   :  { %v334_v20 = vmul.f32 %v785_v7, %v333_v17  ;;  %v314_v21 = vadd.f32 %v310_v16, %v305_v18 }
 0x162   :  { %757 = vmatmul.msk.f32.gmra.mxu2 %vm224_vm3, %v392_v3 }
 0x163   :  { %v787_v23 = vpop.eup %786  ;;  %v751_v13 = vmul.f32 -1.442695, %v314_v21  ;;  %v335_v24 = vadd.f32 %v785_v7, %v334_v20  ;;  %753 = vmatmul.msk.f32.gmra.mxu0 %vm224_vm3, %v396_v5 }
 0x164   :  { %v789_v25 = vpop.eup %788  ;;  %v329_v26 = vadd.f32 1.0, %v787_v23 }
 0x165   :  { %790 = vpow2.f32 %v751_v13  ;;  %v339_v28 = vsel %vm338_vm6, %v785_v7, %v335_v24  ;;  %v347_v29 = vmul.f32 %v789_v25, %v328_v9  ;;  %vm352_vm8 = vweird.f32 %v789_v25  ;;  %v397_v7 = vld [vmem:[%s1194_s6 + $0x10] sm:$0xff]  ;;  %v394_v9 = vld [vmem:[%s1193_s5 + $0x18] sm:$0xff] }
 0x166   :  { %792 = vrcp.f32 %v329_v26  ;;  %v344_v30 = vsel %vm341_vm7, %v343_v27, %v339_v28  ;;  %vm353_vm10 = vmor %vm351_vm9, %vm352_vm8  ;;  %v372_v46 = vand.u32 2147483648, %v329_v26  ;;  %v370_v48 = vand.u32 2147483647, %v329_v26  ;;  %v647_v27 = vld [vmem:[%s1196_s2 + $0x10] sm:$0xff]  ;;  %v648_v28 = vld [vmem:[%s1196_s2 + $0x18] sm:$0xff] }
 0x167   :  { %v565_v31 = vmul.f32 %v344_v30, %v941_v8  ;;  %v348_v32 = vsub.f32 1.0, %v347_v29  ;;  %vm366_vm13 = vweird.f32 %v329_v26  ;;  %v636_v16 = vpop.f32.mrf.mxu3 }
 0x168   :  { %v373_v51 = vor.u32 1.1754944e-38, %v372_v46  ;;  %vm371_vm15 = vcmp.eq.f32.partialorder %v370_v48, 8.507059e+37 }
 0x169   :  { %764 = vmatmul.msk.f32.vlgmr.msra.gmra.mxu1 %vm64_vm2, %v565_v31  ;;  %v349_v34 = vmul.f32 %v789_v25, %v348_v32  ;;  %v481_v32 = vld [vmem:[%s1197_s14] sm:$0xff] }
 0x16a   :  { %758 = vmatmul.msk.f32.gmra.mxu2 %vm224_vm3, %v393_v6  ;;  %v1135_v6 = vld [vmem:[%s1195_s15] ss:$0 sm:$0xff] }
 0x16b   :  { %v791_v36 = vpop.eup %790  ;;  %v350_v37 = vadd.f32 %v789_v25, %v349_v34  ;;  %754 = vmatmul.msk.f32.gmra.mxu0 %vm224_vm3, %v397_v7 }
 0x16c   :  { %v793_v38 = vpop.eup %792  ;;  %v330_v39 = vadd.f32 1.0, %v791_v36 }
 0x16d   :  { %v354_v41 = vsel %vm353_vm10, %v789_v25, %v350_v37  ;;  %v362_v42 = vmul.f32 %v793_v38, %v329_v26  ;;  %vm367_vm12 = vweird.f32 %v793_v38  ;;  %v645_v25 = vld [vmem:[%s1196_s2] sm:$0xff]  ;;  %v646_v26 = vld [vmem:[%s1196_s2 + $0x8] sm:$0xff] }
 0x16e   :  { %794 = vrcp.f32 %v330_v39  ;;  %v359_v43 = vsel %vm356_vm11, %v358_v40, %v354_v41  ;;  %vm368_vm14 = vmor %vm366_vm13, %vm367_vm12  ;;  %v387_v57 = vand.u32 2147483648, %v330_v39  ;;  %v385_v59 = vand.u32 2147483647, %v330_v39 }
 0x16f   :  { %v566_v44 = vmul.f32 %v359_v43, %v923_v4  ;;  %v363_v45 = vsub.f32 1.0, %v362_v42  ;;  %vm381_vm1 = vweird.f32 %v330_v39  ;;  %v639_v18 = vpop.f32.mrf.mxu3 }
 0x170   :  { %v388_v61 = vor.u32 1.1754944e-38, %v387_v57  ;;  %vm386_vm5 = vcmp.eq.f32.partialorder %v385_v59, 8.507059e+37 }
 0x171   :  { %765 = vmatmul.msk.f32.gmra.mxu1 %vm64_vm2, %v566_v44  ;;  %v364_v47 = vmul.f32 %v793_v38, %v363_v45  ;;  %v483_v44 = vld [vmem:[%s1197_s14 + $0x10] sm:$0xff] }
 0x172   :  { %759 = vmatmul.msk.f32.gmra.mxu2 %vm224_vm3, %v394_v9 }
 0x173   :  { %v365_v49 = vadd.f32 %v793_v38, %v364_v47  ;;  %755 = vmatmul.msk.f32.gmra.mxu0 %vm224_vm3, %v398_v14 }
 0x174   :  { %v795_v50 = vpop.eup %794 }
 0x175   :  { %v369_v52 = vsel %vm368_vm14, %v793_v38, %v365_v49  ;;  %v377_v53 = vmul.f32 %v795_v50, %v330_v39  ;;  %vm382_vm0 = vweird.f32 %v795_v50  ;;  %v482_v38 = vld [vmem:[%s1197_s14 + $0x8] sm:$0xff] }
 0x176   :  { %v374_v54 = vsel %vm371_vm15, %v373_v51, %v369_v52  ;;  %vm383_vm4 = vmor %vm381_vm1, %vm382_vm0 }
 0x177   :  { %v567_v55 = vmul.f32 %v374_v54, %v956_v10  ;;  %v378_v56 = vsub.f32 1.0, %v377_v53  ;;  %v642_v20 = vpop.f32.mrf.mxu3  ;;  %v484_v53 = vld [vmem:[%s1197_s14 + $0x18] sm:$0xff] }
 0x179   :  { %766 = vmatmul.msk.f32.gmra.mxu1 %vm64_vm2, %v567_v55  ;;  %v379_v58 = vmul.f32 %v795_v50, %v378_v56 }
 0x17b   :  { %v380_v60 = vadd.f32 %v795_v50, %v379_v58 }
 0x17d   :  { %v384_v62 = vsel %vm383_vm4, %v795_v50, %v380_v60 }
 0x17e   :  { %v389_v63 = vsel %vm386_vm5, %v388_v61, %v384_v62 }
 0x17f   :  { %v568_v0 = vmul.f32 %v389_v63, %v972_v12 }
 0x181   :  { %767 = vmatmul.msk.f32.gmra.mxu1 %vm64_vm2, %v568_v0 }
 0x1d8   :  { %v428_v29 = vpop.f32.mrf.mxu0 }
 0x1dd   :  { %v469_v30 = vpop.f32.mrf.mxu2 }
 0x1de   :  { %v470_v31 = vadd.f32 %v469_v30, %v428_v29 }
 0x1e0   :  { %v431_v33 = vpop.f32.mrf.mxu0  ;;  %v485_v35 = vadd.f32 %v481_v32, %v470_v31 }
 0x1e2   :  { %v760_v37 = vmul.f32 -1.442695, %v485_v35 }
 0x1e4   :  { %796 = vpow2.f32 %v760_v37 }
 0x1e5   :  { %v472_v34 = vpop.f32.mrf.mxu2 }
 0x1e6   :  { %v601_v11 = vpop.f32.mrf.mxu1  ;;  %v473_v36 = vadd.f32 %v472_v34, %v431_v33 }
 0x1e7   :  { %v634_v24 = vadd.f32 %v633_v15, %v601_v11 }
 0x1e8   :  { %v486_v39 = vadd.f32 %v482_v38, %v473_v36  ;;  %v434_v40 = vpop.f32.mrf.mxu0 }
 0x1ea   :  { %v761_v42 = vmul.f32 -1.442695, %v486_v39  ;;  %v797_v45 = vpop.eup %796 }
 0x1eb   :  { %v501_v47 = vadd.f32 1.0, %v797_v45 }
 0x1ec   :  { %798 = vpow2.f32 %v761_v42 }
 0x1ed   :  { %v475_v41 = vpop.f32.mrf.mxu2  ;;  %800 = vrcp.f32 %v501_v47  ;;  %v516_v5 = vand.u32 2147483648, %v501_v47  ;;  %v514_v9 = vand.u32 2147483647, %v501_v47 }
 0x1ee   :  { %v604_v17 = vpop.f32.mrf.mxu1  ;;  %v476_v43 = vadd.f32 %v475_v41, %v434_v40 }
 0x1ef   :  { %v637_v13 = vadd.f32 %v636_v16, %v604_v17  ;;  %v517_v11 = vor.u32 1.1754944e-38, %v516_v5  ;;  %vm515_vm8 = vcmp.eq.f32.partialorder %v514_v9, 8.507059e+37 }
 0x1f0   :  { %v487_v46 = vadd.f32 %v483_v44, %v476_v43  ;;  %v437_v48 = vpop.f32.mrf.mxu0 }
 0x1f2   :  { %v762_v50 = vmul.f32 -1.442695, %v487_v46  ;;  %v799_v52 = vpop.eup %798 }
 0x1f3   :  { %v502_v54 = vadd.f32 1.0, %v799_v52  ;;  %v801_v56 = vpop.eup %800 }
 0x1f4   :  { %802 = vpow2.f32 %v762_v50  ;;  %v506_v59 = vmul.f32 %v801_v56, %v501_v47  ;;  %vm511_vm6 = vweird.f32 %v801_v56 }
 0x1f5   :  { %v478_v49 = vpop.f32.mrf.mxu2  ;;  %804 = vrcp.f32 %v502_v54  ;;  %vm525_vm9 = vweird.f32 %v502_v54 }
 0x1f6   :  { %v607_v19 = vpop.f32.mrf.mxu1  ;;  %v479_v51 = vadd.f32 %v478_v49, %v437_v48  ;;  %v507_v62 = vsub.f32 1.0, %v506_v59 }
 0x1f7   :  { %v640_v23 = vadd.f32 %v639_v18, %v607_v19 }
 0x1f8   :  { %v488_v55 = vadd.f32 %v484_v53, %v479_v51  ;;  %v508_v1 = vmul.f32 %v801_v56, %v507_v62 }
 0x1fa   :  { %v763_v57 = vmul.f32 -1.442695, %v488_v55  ;;  %v803_v58 = vpop.eup %802  ;;  %v509_v7 = vadd.f32 %v801_v56, %v508_v1 }
 0x1fb   :  { %v1127_v60 = vadd.f32 1.0, %v803_v58  ;;  %v805_v61 = vpop.eup %804 }
 0x1fc   :  { %806 = vpow2.f32 %v763_v57  ;;  %v521_v63 = vmul.f32 %v805_v61, %v502_v54  ;;  %vm526_vm10 = vweird.f32 %v805_v61 }
 0x1fd   :  { %808 = vrcp.f32 %v1127_v60  ;;  %vm1140_vm11 = vmor %vm525_vm9, %vm526_vm10  ;;  %vm540_vm13 = vweird.f32 %v1127_v60  ;;  %v546_v38 = vand.u32 2147483648, %v1127_v60  ;;  %v544_v40 = vand.u32 2147483647, %v1127_v60 }
 0x1fe   :  { %v610_v21 = vpop.f32.mrf.mxu1  ;;  %v522_v2 = vsub.f32 1.0, %v521_v63 }
 0x1ff   :  { %v643_v22 = vadd.f32 %v642_v20, %v610_v21  ;;  %v547_v46 = vor.u32 1.1754944e-38, %v546_v38  ;;  %vm545_vm0 = vcmp.eq.f32.partialorder %v544_v40, 8.507059e+37 }
 0x200   :  { %v523_v17 = vmul.f32 %v805_v61, %v522_v2 }
 0x201   :  { %677 = vmatpush.msra.mxu0 %v643_v22  ;;  %v531_v22 = vand.u32 2147483648, %v502_v54 }
 0x202   :  { %v807_v0 = vpop.eup %806  ;;  %v524_v21 = vadd.f32 %v805_v61, %v523_v17 }
 0x203   :  { %678 = vmatpush.msra.mxu0 %v640_v23  ;;  %v1130_v3 = vadd.f32 1.0, %v807_v0  ;;  %v809_v14 = vpop.eup %808  ;;  %v532_v31 = vor.u32 1.1754944e-38, %v531_v22 }
 0x204   :  { %v536_v18 = vmul.f32 %v809_v14, %v1127_v60  ;;  %v528_v30 = vsel %vm1140_vm11, %v805_v61, %v524_v21  ;;  %vm541_vm14 = vweird.f32 %v809_v14 }
 0x205   :  { %679 = vmatpush.msra.mxu0 %v637_v13  ;;  %810 = vrcp.f32 %v1130_v3  ;;  %vm1156_vm15 = vmor %vm540_vm13, %vm541_vm14  ;;  %vm555_vm1 = vweird.f32 %v1130_v3  ;;  %v561_v53 = vand.u32 2147483648, %v1130_v3 }
 0x206   :  { %v537_v23 = vsub.f32 1.0, %v536_v18 }
 0x207   :  { %680 = vmatpush.msra.mxu0 %v634_v24  ;;  %v529_v24 = vand.u32 2147483647, %v502_v54  ;;  %v559_v54 = vand.u32 2147483647, %v1130_v3  ;;  %v562_v58 = vor.u32 1.1754944e-38, %v561_v53 }
 0x208   :  { %773 = vmatmul.msk.f32.vlgmr.msra.gmra.mxu0 %vm224_vm3, %v645_v25  ;;  %v538_v35 = vmul.f32 %v809_v14, %v537_v23 }
 0x209   :  { %vm530_vm12 = vcmp.eq.f32.partialorder %v529_v24, 8.507059e+37 }
 0x20a   :  { %v533_v37 = vsel %vm530_vm12, %v532_v31, %v528_v30  ;;  %v539_v39 = vadd.f32 %v809_v14, %v538_v35 }
 0x20b   :  { %v811_v25 = vpop.eup %810  ;;  %v703_v42 = vsub.f32 1.0, %v533_v37  ;;  %v699_v45 = vmul.f32 %v533_v37, %v923_v4 }
 0x20c   :  { %v551_v33 = vmul.f32 %v811_v25, %v1130_v3  ;;  %v543_v49 = vsel %vm1156_vm15, %v809_v14, %v539_v39  ;;  %vm556_vm4 = vweird.f32 %v811_v25 }
 0x20d   :  { %v548_v52 = vsel %vm545_vm0, %v547_v46, %v543_v49  ;;  %vm557_vm5 = vmor %vm555_vm1, %vm556_vm4 }
 0x20e   :  { %v704_v55 = vsub.f32 1.0, %v548_v52  ;;  %v700_v60 = vmul.f32 %v548_v52, %v956_v10 }
 0x210   :  { %774 = vmatmul.msk.f32.gmra.mxu0 %vm224_vm3, %v646_v26 }
 0x218   :  { %775 = vmatmul.msk.f32.gmra.mxu0 %vm224_vm3, %v647_v27 }
 0x220   :  { %776 = vmatmul.msk.f32.gmra.mxu0 %vm224_vm3, %v648_v28  ;;  %vm510_vm3 = vweird.f32 %v501_v47 }
 0x221   :  { %vm512_vm7 = vmor %vm510_vm3, %vm511_vm6  ;;  %vm560_vm3 = vcmp.eq.f32.partialorder %v559_v54, 8.507059e+37 }
 0x222   :  { %v513_v19 = vsel %vm512_vm7, %v801_v56, %v509_v7 }
 0x223   :  { %v518_v20 = vsel %vm515_vm8, %v517_v11, %v513_v19 }
 0x224   :  { %v702_v26 = vsub.f32 1.0, %v518_v20  ;;  %v698_v29 = vmul.f32 %v518_v20, %v941_v8  ;;  %v552_v8 = vsub.f32 1.0, %v551_v33 }
 0x226   :  { %v553_v50 = vmul.f32 %v811_v25, %v552_v8 }
 0x228   :  { %v554_v4 = vadd.f32 %v811_v25, %v553_v50 }
 0x22a   :  { %v558_v62 = vsel %vm557_vm5, %v811_v25, %v554_v4 }
 0x22b   :  { %v563_v0 = vsel %vm560_vm3, %v562_v58, %v558_v62 }
 0x22c   :  { %v705_v1 = vsub.f32 1.0, %v563_v0  ;;  %v701_v3 = vmul.f32 %v563_v0, %v972_v12 }
 0x285   :  { %v682_v15 = vpop.f32.mrf.mxu0 }
 0x286   :  { %v683_v16 = vadd.f32 %v1135_v6, %v682_v15 }
 0x288   :  { %812 = vtanh.f32 %v683_v16 }
 0x28d   :  { %v685_v27 = vpop.f32.mrf.mxu0 }
 0x28e   :  { %v813_v28 = vpop.eup %812  ;;  %v686_v32 = vadd.f32 %v1135_v6, %v685_v27 }
 0x28f   :  { %v706_v34 = vmul.f32 %v813_v28, %v702_v26 }
 0x290   :  { %814 = vtanh.f32 %v686_v32 }
 0x291   :  { %v710_v36 = vadd.f32 %v706_v34, %v698_v29 }
 0x293   :  { %714 = vst.msk [vmem:[%s1198_s16] sm:$0xff] %vm64_vm2, %v710_v36 }
 0x295   :  { %v688_v43 = vpop.f32.mrf.mxu0 }
 0x296   :  { %v815_v44 = vpop.eup %814  ;;  %v689_v47 = vadd.f32 %v1135_v6, %v688_v43 }
 0x297   :  { %v707_v48 = vmul.f32 %v815_v44, %v703_v42 }
 0x298   :  { %816 = vtanh.f32 %v689_v47 }
 0x299   :  { %v711_v51 = vadd.f32 %v707_v48, %v699_v45 }
 0x29b   :  { %715 = vst.msk [vmem:[%s1198_s16 + $0x8] sm:$0xff] %vm64_vm2, %v711_v51 }
 0x29d   :  { %v691_v56 = vpop.f32.mrf.mxu0 }
 0x29e   :  { %v817_v57 = vpop.eup %816  ;;  %v692_v59 = vadd.f32 %v1135_v6, %v691_v56 }
 0x29f   :  { %v708_v61 = vmul.f32 %v817_v57, %v704_v55 }
 0x2a0   :  { %818 = vtanh.f32 %v692_v59 }
 0x2a1   :  { %v712_v63 = vadd.f32 %v708_v61, %v700_v60 }
 0x2a3   :  { %716 = vst.msk [vmem:[%s1198_s16 + $0x10] sm:$0xff] %vm64_vm2, %v712_v63 }
 0x2a6   :  { %v819_v2 = vpop.eup %818 }
 0x2a7   :  { %v709_v5 = vmul.f32 %v819_v2, %v705_v1 }
 0x2a9   :  { %v713_v7 = vadd.f32 %v709_v5, %v701_v3 }
 0x2ab   :  { %717 = vst.msk [vmem:[%s1198_s16 + $0x18] sm:$0xff] %vm64_vm2, %v713_v7 }

</bundles_post_ra>
